<compile_context>
chip_gen: v6e
topology: v6e:2x2x1
jax: 0.10.0
libtpu: 0.0.40
codegen_flags: <defaults>
</compile_context>

<pallas_src>
import math
import functools

import jax
import jax.numpy as jnp
from jax.experimental import pallas as pl
from jax.experimental.pallas import tpu as pltpu

EPS = 1e-5


def _round_up(n, m):
    return ((n + m - 1) // m) * m


def _encoder_layer_kernel(head_num, d_model, seq_len,
                          x_ref, wqkv_ref, wo_ref, w1_ref, w2_ref, bias_ref,
                          o_ref):
    _, Sp, Dp = x_ref.shape
    Dffp = w1_ref.shape[1]
    inv_d = 1.0 / float(d_model)

    x = x_ref[0].astype(jnp.float32)                 # (Sp, Dp) current batch row
    xb = x.astype(jnp.bfloat16)

    bias = bias_ref[...]                             # (8, W) f32, one resident load
    bo    = bias[0:1, :Dp]
    g1    = bias[1:2, :Dp]
    beta1 = bias[2:3, :Dp]
    b1    = bias[3:4, :Dffp]
    b2    = bias[4:5, :Dp]
    g2    = bias[5:6, :Dp]
    beta2 = bias[6:7, :Dp]
    dmask = bias[7:8, :Dp]                           # 1.0 on real columns, 0 on padding

    # ---- fused QKV projection for all heads (bf16 MXU, f32 accum), bf16 once ----
    qkv = jnp.dot(xb, wqkv_ref[...],
                  preferred_element_type=jnp.float32).astype(jnp.bfloat16)   # (Sp, 3*H*Dp)

    # Additive key mask for padded sequence positions (compile-time iota).
    if Sp != seq_len:
        kidx = jax.lax.broadcasted_iota(jnp.int32, (1, Sp), 1)
        key_bias = jnp.where(kidx < seq_len, 0.0, -1e30).astype(jnp.float32)
    else:
        key_bias = None

    # ---- attention per head (heads unrolled statically), accumulate Wo ----
    o = jnp.zeros((Sp, Dp), jnp.float32)
    for h in range(head_num):
        base = 3 * h * Dp
        q = qkv[:, base:base + Dp]                   # bf16, scale folded into Wq
        k = qkv[:, base + Dp:base + 2 * Dp]
        v = qkv[:, base + 2 * Dp:base + 3 * Dp]

        # scores: contraction over the hidden axis (no explicit k.T transpose)
        s = jnp.einsum("sd,td->st", q, k,
                       preferred_element_type=jnp.float32)                  # (Sp, Sp)
        if key_bias is not None:
            s = s + key_bias
        s = s - jnp.max(s, axis=-1, keepdims=True)
        p = jnp.exp(s)                               # unnormalized probabilities
        l = jnp.sum(p, axis=-1, keepdims=True)       # (Sp, 1)

        hv = jnp.dot(p.astype(jnp.bfloat16), v,
                     preferred_element_type=jnp.float32)                    # (Sp, Dp)
        hv = hv * pl.reciprocal(l, approx=True)      # deferred softmax normalization

        # per-head slice of the output projection, summed over heads
        o = o + jnp.dot(hv.astype(jnp.bfloat16), wo_ref[h],
                        preferred_element_type=jnp.float32)

    o = o + bo

    # ---- residual + LayerNorm 1 (masked stats over the true d_model cols) ----
    h1 = x + o
    mu1 = jnp.sum(h1, axis=-1, keepdims=True) * inv_d
    c1 = (h1 - mu1) * dmask
    var1 = jnp.sum(c1 * c1, axis=-1, keepdims=True) * inv_d
    y1 = c1 * jax.lax.rsqrt(var1 + EPS) * g1 + beta1

    # ---- position-wise FFN (bf16 MXU, f32 accum) ----
    hmid = jnp.dot(y1.astype(jnp.bfloat16), w1_ref[...],
                   preferred_element_type=jnp.float32) + b1
    hmid = jnp.maximum(hmid, 0.0)
    y2 = jnp.dot(hmid.astype(jnp.bfloat16), w2_ref[...],
                 preferred_element_type=jnp.float32) + b2

    # ---- residual with the ORIGINAL x (as in the PyTorch code) + LayerNorm 2 ----
    h2 = y2 + x
    mu2 = jnp.sum(h2, axis=-1, keepdims=True) * inv_d
    c2 = (h2 - mu2) * dmask
    var2 = jnp.sum(c2 * c2, axis=-1, keepdims=True) * inv_d
    out = c2 * jax.lax.rsqrt(var2 + EPS) * g2 + beta2

    o_ref[0] = out.astype(o_ref.dtype)


def _prepare_params(p, head_num, D, d_ff, Dp, Dffp, W):
    """Pad / fuse the unpadded f32 params into lane-dense kernel operands."""
    sqrt_d = math.sqrt(D)

    def pad2(a, rows, cols):
        return jnp.pad(a, ((0, rows - a.shape[0]), (0, cols - a.shape[1])))

    qkv_cols, wo_blocks = [], []
    for h in range(head_num):
        qkv_cols.append(pad2(p["wq"][h] / sqrt_d, Dp, Dp))   # fold 1/sqrt(d_k) into Wq
        qkv_cols.append(pad2(p["wk"][h], Dp, Dp))
        qkv_cols.append(pad2(p["wv"][h], Dp, Dp))
        wo_blocks.append(pad2(p["wo"][h * D:(h + 1) * D, :], Dp, Dp))
    wqkv = jnp.concatenate(qkv_cols, axis=1).astype(jnp.bfloat16)   # (Dp, 3*H*Dp)
    wo_s = jnp.stack(wo_blocks, axis=0).astype(jnp.bfloat16)        # (H, Dp, Dp)

    w1p = pad2(p["w1"], Dp, Dffp).astype(jnp.bfloat16)
    w2p = pad2(p["w2"], Dffp, Dp).astype(jnp.bfloat16)

    def row(v, width):
        v = jnp.reshape(v, (-1,))
        return jnp.pad(v, (0, width - v.shape[0]))

    dmask = (jnp.arange(W) < D).astype(jnp.float32)
    bias = jnp.stack([
        row(p["bo"], W), row(p["g1"], W), row(p["beta1"], W),
        row(p["b1"], W), row(p["b2"], W), row(p["g2"], W),
        row(p["beta2"], W), dmask,
    ], axis=0)                                                      # (8, W) f32

    return wqkv, wo_s, w1p, w2p, bias


def _vmem_limit_bytes(Sp, Dp, Dffp, H, W):
    """Rough per-step VMEM requirement (double-buffered I/O + resident weights
    + intermediates with margin), clamped to sane per-chip bounds."""
    weights = 2 * 2 * (Dp * 3 * H * Dp + H * Dp * Dp + Dp * Dffp + Dffp * Dp)  # bf16 x2 bufs
    bias = 2 * 8 * W * 4
    io = 2 * 2 * (Sp * Dp * 4)                                                 # x + out blocks
    inter = (Sp * 3 * H * Dp * 2        # qkv bf16
             + 3 * Sp * Sp * 4          # scores / probs
             + Sp * Dffp * 4            # hmid
             + 6 * Sp * Dp * 4)         # o / h1 / y1 / y2 / out / misc
    est = weights + bias + io + 3 * inter
    return int(min(96 * 1024 * 1024, max(32 * 1024 * 1024, est)))


def _cost_estimate(B, Sp, Dp, Dffp, H):
    flops_per_b = (2 * Sp * Dp * 3 * H * Dp        # qkv projection
                   + 4 * Sp * Sp * Dp * H          # q@k^T and p@v
                   + 2 * Sp * Dp * Dp * H          # output projection
                   + 4 * Sp * Dp * Dffp)           # ffn
    bytes_accessed = (2 * B * Sp * Dp * 4          # x in + out
                      + 2 * (Dp * 3 * H * Dp + H * Dp * Dp + Dp * Dffp + Dffp * Dp))
    return pl.CostEstimate(flops=int(B * flops_per_b),
                           transcendentals=int(B * (Sp * Sp * H + 2 * Sp)),
                           bytes_accessed=int(bytes_accessed))


def transformer_encoder_layer(x, params, head_num):
    """x: [B, S, D] float32. params: dict of unpadded weights (see init_params)."""
    B, S, D = x.shape
    d_ff = params["w1"].shape[-1]
    H = head_num

    # TODO(synk): for real ViT sizes (D=768/1024, d_ff=3072) align Dp/Dffp and
    # the row tile to 256 to fully feed the v6e/v7x 2x256x256 MXU.
    Dp = _round_up(D, 128)
    Dffp = _round_up(d_ff, 128)
    Sp = _round_up(S, 8)
    W = max(Dp, Dffp)

    xp = jnp.pad(x, ((0, 0), (0, Sp - S), (0, Dp - D)))
    wqkv, wo_s, w1p, w2p, bias = _prepare_params(params, H, D, d_ff, Dp, Dffp, W)

    kernel = functools.partial(_encoder_layer_kernel, H, D, S)

    out_p = pl.pallas_call(
        kernel,
        out_shape=jax.ShapeDtypeStruct((B, Sp, Dp), x.dtype),
        grid_spec=pltpu.PrefetchScalarGridSpec(
            num_scalar_prefetch=0,
            grid=(B,),
            in_specs=[
                pl.BlockSpec((1, Sp, Dp), lambda b: (b, 0, 0)),       # x (padded), per batch
                pl.BlockSpec((Dp, 3 * H * Dp), lambda b: (0, 0)),     # fused Wqkv (resident)
                pl.BlockSpec((H, Dp, Dp), lambda b: (0, 0, 0)),       # Wo per head (resident)
                pl.BlockSpec((Dp, Dffp), lambda b: (0, 0)),           # fc W1 (resident)
                pl.BlockSpec((Dffp, Dp), lambda b: (0, 0)),           # fc W2 (resident)
                pl.BlockSpec((8, W), lambda b: (0, 0)),               # packed biases/ln/mask
            ],
            out_specs=pl.BlockSpec((1, Sp, Dp), lambda b: (b, 0, 0)),
        ),
        compiler_params=pltpu.CompilerParams(
            dimension_semantics=("parallel",),                        # shard batch on v7x
            vmem_limit_bytes=_vmem_limit_bytes(Sp, Dp, Dffp, H, W)),
        cost_estimate=_cost_estimate(B, Sp, Dp, Dffp, H),
    )(xp, wqkv, wo_s, w1p, w2p, bias)

    return out_p[:, :S, :D]


def init_params(key, hidden_dim, head_num, d_ff):
    ks = jax.random.split(key, 8)
    s = 0.05
    D, H = hidden_dim, head_num
    # Linear weights stored already transposed (in_features, out_features)
    # so the math is x @ W (PyTorch does x @ W^T).
    return {
        "wq": s * jax.random.normal(ks[0], (H, D, D), jnp.float32),
        "wk": s * jax.random.normal(ks[1], (H, D, D), jnp.float32),
        "wv": s * jax.random.normal(ks[2], (H, D, D), jnp.float32),
        "wo": s * jax.random.normal(ks[3], (H * D, D), jnp.float32),
        "bo": s * jax.random.normal(ks[4], (1, D), jnp.float32),
        "g1": jnp.ones((1, D), jnp.float32),
        "beta1": jnp.zeros((1, D), jnp.float32),
        "w1": s * jax.random.normal(ks[5], (D, d_ff), jnp.float32),
        "b1": s * jax.random.normal(ks[6], (1, d_ff), jnp.float32),
        "w2": s * jax.random.normal(ks[7], (d_ff, D), jnp.float32),
        "b2": jnp.zeros((1, D), jnp.float32),
        "g2": jnp.ones((1, D), jnp.float32),
        "beta2": jnp.zeros((1, D), jnp.float32),
    }


def reference_forward(x, p, head_num):
    """Pure-JAX (f32) reference reproducing the PyTorch forward."""
    D = x.shape[-1]
    outs = []
    for h in range(head_num):
        q = x @ p["wq"][h]
        k = x @ p["wk"][h]
        v = x @ p["wv"][h]
        att = jnp.einsum("bsd,btd->bst", q, k) / math.sqrt(D)
        att = jax.nn.softmax(att, axis=-1)
        outs.append(jnp.einsum("bst,btd->bsd", att, v))
    o = outs[0] if head_num == 1 else jnp.concatenate(outs, axis=-1)
    o = o @ p["wo"] + p["bo"]

    def ln(h, g, b):
        mu = jnp.mean(h, axis=-1, keepdims=True)
        var = jnp.mean((h - mu) ** 2, axis=-1, keepdims=True)
        return (h - mu) / jnp.sqrt(var + EPS) * g + b

    y1 = ln(x + o, p["g1"], p["beta1"])
    y2 = jnp.maximum(y1 @ p["w1"] + p["b1"], 0.0) @ p["w2"] + p["b2"]
    return ln(y2 + x, p["g2"], p["beta2"])


if __name__ == "__main__":
    B, S, D = 2, 8, 32
    HEAD_NUM = 1          # module's forward only type-checks for head_num == 1
    D_FF = 64

    key = jax.random.PRNGKey(0)
    kx, kp = jax.random.split(key)
    x = jax.random.normal(kx, (B, S, D), jnp.float32)
    params = init_params(kp, D, HEAD_NUM, D_FF)

    out = transformer_encoder_layer(x, params, HEAD_NUM)
    out = jax.block_until_ready(out)

    ref = reference_forward(x, params, HEAD_NUM)
    assert out.shape == (B, S, D)
    # matmul operands are bf16 (f32 accumulation) -> looser tolerance vs f32 ref
    assert jnp.allclose(out, ref, atol=2e-2, rtol=2e-2), "mismatch vs reference"

    print("KERNEL_OK")
</pallas_src>

<mosaic_0001>
module attributes {stable_mosaic.version = 11 : i64} {
  func.func @_encoder_layer_kernel(%arg0: i32, %arg1: memref<1x8x128xf32, #tpu.memory_space<vmem>>, %arg2: memref<128x384xbf16, #tpu.memory_space<vmem>>, %arg3: memref<1x128x128xbf16, #tpu.memory_space<vmem>>, %arg4: memref<128x128xbf16, #tpu.memory_space<vmem>>, %arg5: memref<128x128xbf16, #tpu.memory_space<vmem>>, %arg6: memref<8x128xf32, #tpu.memory_space<vmem>>, %arg7: memref<1x8x128xf32, #tpu.memory_space<vmem>>) attributes {dimension_semantics = [#tpu.dimension_semantics<parallel>], iteration_bounds = array<i64: 2>, scalar_prefetch = 0 : i64, scratch_operands = 0 : i64, tpu.core_type = #tpu.core_type<tc>, window_params = [{transform_indices = @transform_0, window_bounds = array<i64: 1, 8, 128>}, {pipeline_mode = #tpu.pipeline_mode<synchronous>, transform_indices = @transform_1, window_bounds = array<i64: 128, 384>}, {pipeline_mode = #tpu.pipeline_mode<synchronous>, transform_indices = @transform_2, window_bounds = array<i64: 1, 128, 128>}, {pipeline_mode = #tpu.pipeline_mode<synchronous>, transform_indices = @transform_3, window_bounds = array<i64: 128, 128>}, {pipeline_mode = #tpu.pipeline_mode<synchronous>, transform_indices = @transform_4, window_bounds = array<i64: 128, 128>}, {pipeline_mode = #tpu.pipeline_mode<synchronous>, transform_indices = @transform_5, window_bounds = array<i64: 8, 128>}, {transform_indices = @transform_6, window_bounds = array<i64: 1, 8, 128>}]} {
    %c0 = arith.constant 0 : index
    %c0_0 = arith.constant 0 : index
    %c0_1 = arith.constant 0 : index
    %0 = vector.load %arg1[%c0, %c0_0, %c0_1] : memref<1x8x128xf32, #tpu.memory_space<vmem>>, vector<1x8x128xf32>
    %1 = vector.shape_cast %0 : vector<1x8x128xf32> to vector<8x128xf32>
    %2 = arith.truncf %1 : vector<8x128xf32> to vector<8x128xbf16>
    %c0_2 = arith.constant 0 : index
    %c0_3 = arith.constant 0 : index
    %3 = vector.load %arg6[%c0_2, %c0_3] : memref<8x128xf32, #tpu.memory_space<vmem>>, vector<8x128xf32>
    %4 = vector.extract_strided_slice %3 {offsets = [0, 0], sizes = [1, 128], strides = [1, 1]} : vector<8x128xf32> to vector<1x128xf32>
    %5 = vector.extract_strided_slice %3 {offsets = [1, 0], sizes = [1, 128], strides = [1, 1]} : vector<8x128xf32> to vector<1x128xf32>
    %6 = vector.extract_strided_slice %3 {offsets = [2, 0], sizes = [1, 128], strides = [1, 1]} : vector<8x128xf32> to vector<1x128xf32>
    %7 = vector.extract_strided_slice %3 {offsets = [3, 0], sizes = [1, 128], strides = [1, 1]} : vector<8x128xf32> to vector<1x128xf32>
    %8 = vector.extract_strided_slice %3 {offsets = [4, 0], sizes = [1, 128], strides = [1, 1]} : vector<8x128xf32> to vector<1x128xf32>
    %9 = vector.extract_strided_slice %3 {offsets = [5, 0], sizes = [1, 128], strides = [1, 1]} : vector<8x128xf32> to vector<1x128xf32>
    %10 = vector.extract_strided_slice %3 {offsets = [6, 0], sizes = [1, 128], strides = [1, 1]} : vector<8x128xf32> to vector<1x128xf32>
    %11 = vector.extract_strided_slice %3 {offsets = [7, 0], sizes = [1, 128], strides = [1, 1]} : vector<8x128xf32> to vector<1x128xf32>
    %c0_4 = arith.constant 0 : index
    %c0_5 = arith.constant 0 : index
    %12 = vector.load %arg2[%c0_4, %c0_5] : memref<128x384xbf16, #tpu.memory_space<vmem>>, vector<128x384xbf16>
    %cst = arith.constant dense<0.000000e+00> : vector<8x384xf32>
    %13 = tpu.matmul %2, %12, %cst {dimension_numbers = #tpu.dot_dimension_numbers<[1], [0], [0], [1], [0, 0, 1, 1], [], []>} : vector<8x128xbf16>, vector<128x384xbf16>, vector<8x384xf32> -> vector<8x384xf32>
    %14 = arith.truncf %13 : vector<8x384xf32> to vector<8x384xbf16>
    %cst_6 = arith.constant 0.000000e+00 : f32
    %15 = vector.broadcast %cst_6 : f32 to vector<8x128xf32>
    %16 = vector.extract_strided_slice %14 {offsets = [0, 0], sizes = [8, 128], strides = [1, 1]} : vector<8x384xbf16> to vector<8x128xbf16>
    %17 = vector.extract_strided_slice %14 {offsets = [0, 128], sizes = [8, 128], strides = [1, 1]} : vector<8x384xbf16> to vector<8x128xbf16>
    %18 = vector.extract_strided_slice %14 {offsets = [0, 256], sizes = [8, 128], strides = [1, 1]} : vector<8x384xbf16> to vector<8x128xbf16>
    "tpu.trace_start"() <{level = 10 : i32, message = "sd,td->st"}> : () -> ()
    %cst_7 = arith.constant dense<0.000000e+00> : vector<8x8xf32>
    %19 = tpu.matmul %16, %17, %cst_7 {dimension_numbers = #tpu.dot_dimension_numbers<[1], [1], [0], [0], [0, 0, 1, 0], [], []>} : vector<8x128xbf16>, vector<8x128xbf16>, vector<8x8xf32> -> vector<8x8xf32>
    "tpu.trace_stop"() : () -> ()
    %cst_8 = arith.constant dense<0xFF800000> : vector<8xf32>
    %20 = vector.multi_reduction <maximumf>, %19, %cst_8 [1] : vector<8x8xf32> to vector<8xf32>
    %21 = vector.shape_cast %20 : vector<8xf32> to vector<8x1xf32>
    %22 = vector.broadcast %21 : vector<8x1xf32> to vector<8x8xf32>
    %23 = arith.subf %19, %22 : vector<8x8xf32>
    %24 = math.exp %23 : vector<8x8xf32>
    %cst_9 = arith.constant dense<0.000000e+00> : vector<8xf32>
    %25 = vector.multi_reduction <add>, %24, %cst_9 [1] : vector<8x8xf32> to vector<8xf32>
    %26 = vector.shape_cast %25 : vector<8xf32> to vector<8x1xf32>
    %27 = arith.truncf %24 : vector<8x8xf32> to vector<8x8xbf16>
    %cst_10 = arith.constant dense<0.000000e+00> : vector<8x128xf32>
    %28 = tpu.matmul %27, %18, %cst_10 {dimension_numbers = #tpu.dot_dimension_numbers<[1], [0], [0], [1], [0, 0, 1, 1], [], []>} : vector<8x8xbf16>, vector<8x128xbf16>, vector<8x128xf32> -> vector<8x128xf32>
    %29 = tpu.reciprocal %26 {approx = true} : vector<8x1xf32> -> vector<8x1xf32>
    %30 = vector.broadcast %29 : vector<8x1xf32> to vector<8x128xf32>
    %31 = arith.mulf %28, %30 : vector<8x128xf32>
    %32 = arith.truncf %31 : vector<8x128xf32> to vector<8x128xbf16>
    %c0_11 = arith.constant 0 : index
    %c0_12 = arith.constant 0 : index
    %c0_13 = arith.constant 0 : index
    %33 = vector.load %arg3[%c0_11, %c0_12, %c0_13] : memref<1x128x128xbf16, #tpu.memory_space<vmem>>, vector<1x128x128xbf16>
    %34 = vector.shape_cast %33 : vector<1x128x128xbf16> to vector<128x128xbf16>
    %cst_14 = arith.constant dense<0.000000e+00> : vector<8x128xf32>
    %35 = tpu.matmul %32, %34, %cst_14 {dimension_numbers = #tpu.dot_dimension_numbers<[1], [0], [0], [1], [0, 0, 1, 1], [], []>} : vector<8x128xbf16>, vector<128x128xbf16>, vector<8x128xf32> -> vector<8x128xf32>
    %36 = arith.addf %15, %35 : vector<8x128xf32>
    %37 = vector.broadcast %4 : vector<1x128xf32> to vector<8x128xf32>
    %38 = arith.addf %36, %37 : vector<8x128xf32>
    %39 = arith.addf %1, %38 : vector<8x128xf32>
    %cst_15 = arith.constant dense<0.000000e+00> : vector<8xf32>
    %40 = vector.multi_reduction <add>, %39, %cst_15 [1] : vector<8x128xf32> to vector<8xf32>
    %41 = vector.shape_cast %40 : vector<8xf32> to vector<8x1xf32>
    %cst_16 = arith.constant 3.125000e-02 : f32
    %42 = vector.broadcast %cst_16 : f32 to vector<8x1xf32>
    %43 = arith.mulf %41, %42 : vector<8x1xf32>
    %44 = vector.broadcast %43 : vector<8x1xf32> to vector<8x128xf32>
    %45 = arith.subf %39, %44 : vector<8x128xf32>
    %46 = vector.broadcast %11 : vector<1x128xf32> to vector<8x128xf32>
    %47 = arith.mulf %45, %46 : vector<8x128xf32>
    %48 = arith.mulf %47, %47 : vector<8x128xf32>
    %cst_17 = arith.constant dense<0.000000e+00> : vector<8xf32>
    %49 = vector.multi_reduction <add>, %48, %cst_17 [1] : vector<8x128xf32> to vector<8xf32>
    %50 = vector.shape_cast %49 : vector<8xf32> to vector<8x1xf32>
    %cst_18 = arith.constant 3.125000e-02 : f32
    %51 = vector.broadcast %cst_18 : f32 to vector<8x1xf32>
    %52 = arith.mulf %50, %51 : vector<8x1xf32>
    %cst_19 = arith.constant 9.99999974E-6 : f32
    %53 = vector.broadcast %cst_19 : f32 to vector<8x1xf32>
    %54 = arith.addf %52, %53 : vector<8x1xf32>
    %55 = math.rsqrt %54 : vector<8x1xf32>
    %56 = vector.broadcast %55 : vector<8x1xf32> to vector<8x128xf32>
    %57 = arith.mulf %47, %56 : vector<8x128xf32>
    %58 = vector.broadcast %5 : vector<1x128xf32> to vector<8x128xf32>
    %59 = arith.mulf %57, %58 : vector<8x128xf32>
    %60 = vector.broadcast %6 : vector<1x128xf32> to vector<8x128xf32>
    %61 = arith.addf %59, %60 : vector<8x128xf32>
    %62 = arith.truncf %61 : vector<8x128xf32> to vector<8x128xbf16>
    %c0_20 = arith.constant 0 : index
    %c0_21 = arith.constant 0 : index
    %63 = vector.load %arg4[%c0_20, %c0_21] : memref<128x128xbf16, #tpu.memory_space<vmem>>, vector<128x128xbf16>
    %cst_22 = arith.constant dense<0.000000e+00> : vector<8x128xf32>
    %64 = tpu.matmul %62, %63, %cst_22 {dimension_numbers = #tpu.dot_dimension_numbers<[1], [0], [0], [1], [0, 0, 1, 1], [], []>} : vector<8x128xbf16>, vector<128x128xbf16>, vector<8x128xf32> -> vector<8x128xf32>
    %65 = vector.broadcast %7 : vector<1x128xf32> to vector<8x128xf32>
    %66 = arith.addf %64, %65 : vector<8x128xf32>
    %cst_23 = arith.constant 0.000000e+00 : f32
    %67 = vector.broadcast %cst_23 : f32 to vector<8x128xf32>
    %68 = arith.maximumf %66, %67 : vector<8x128xf32>
    %69 = arith.truncf %68 : vector<8x128xf32> to vector<8x128xbf16>
    %c0_24 = arith.constant 0 : index
    %c0_25 = arith.constant 0 : index
    %70 = vector.load %arg5[%c0_24, %c0_25] : memref<128x128xbf16, #tpu.memory_space<vmem>>, vector<128x128xbf16>
    %cst_26 = arith.constant dense<0.000000e+00> : vector<8x128xf32>
    %71 = tpu.matmul %69, %70, %cst_26 {dimension_numbers = #tpu.dot_dimension_numbers<[1], [0], [0], [1], [0, 0, 1, 1], [], []>} : vector<8x128xbf16>, vector<128x128xbf16>, vector<8x128xf32> -> vector<8x128xf32>
    %72 = vector.broadcast %8 : vector<1x128xf32> to vector<8x128xf32>
    %73 = arith.addf %71, %72 : vector<8x128xf32>
    %74 = arith.addf %73, %1 : vector<8x128xf32>
    %cst_27 = arith.constant dense<0.000000e+00> : vector<8xf32>
    %75 = vector.multi_reduction <add>, %74, %cst_27 [1] : vector<8x128xf32> to vector<8xf32>
    %76 = vector.shape_cast %75 : vector<8xf32> to vector<8x1xf32>
    %cst_28 = arith.constant 3.125000e-02 : f32
    %77 = vector.broadcast %cst_28 : f32 to vector<8x1xf32>
    %78 = arith.mulf %76, %77 : vector<8x1xf32>
    %79 = vector.broadcast %78 : vector<8x1xf32> to vector<8x128xf32>
    %80 = arith.subf %74, %79 : vector<8x128xf32>
    %81 = vector.broadcast %11 : vector<1x128xf32> to vector<8x128xf32>
    %82 = arith.mulf %80, %81 : vector<8x128xf32>
    %83 = arith.mulf %82, %82 : vector<8x128xf32>
    %cst_29 = arith.constant dense<0.000000e+00> : vector<8xf32>
    %84 = vector.multi_reduction <add>, %83, %cst_29 [1] : vector<8x128xf32> to vector<8xf32>
    %85 = vector.shape_cast %84 : vector<8xf32> to vector<8x1xf32>
    %cst_30 = arith.constant 3.125000e-02 : f32
    %86 = vector.broadcast %cst_30 : f32 to vector<8x1xf32>
    %87 = arith.mulf %85, %86 : vector<8x1xf32>
    %cst_31 = arith.constant 9.99999974E-6 : f32
    %88 = vector.broadcast %cst_31 : f32 to vector<8x1xf32>
    %89 = arith.addf %87, %88 : vector<8x1xf32>
    %90 = math.rsqrt %89 : vector<8x1xf32>
    %91 = vector.broadcast %90 : vector<8x1xf32> to vector<8x128xf32>
    %92 = arith.mulf %82, %91 : vector<8x128xf32>
    %93 = vector.broadcast %9 : vector<1x128xf32> to vector<8x128xf32>
    %94 = arith.mulf %92, %93 : vector<8x128xf32>
    %95 = vector.broadcast %10 : vector<1x128xf32> to vector<8x128xf32>
    %96 = arith.addf %94, %95 : vector<8x128xf32>
    %c0_32 = arith.constant 0 : index
    %c0_33 = arith.constant 0 : index
    %c0_34 = arith.constant 0 : index
    %97 = vector.load %arg7[%c0_32, %c0_33, %c0_34] : memref<1x8x128xf32, #tpu.memory_space<vmem>>, vector<1x8x128xf32>
    %98 = vector.shape_cast %97 : vector<1x8x128xf32> to vector<8x128xf32>
    %99 = vector.shape_cast %96 : vector<8x128xf32> to vector<1x8x128xf32>
    tpu.vector_store %arg7[%c0_32, %c0_33, %c0_34], %99 {strides = array<i32>} : memref<1x8x128xf32, #tpu.memory_space<vmem>>, vector<1x8x128xf32>,
    return
  }
  func.func @transform_0(%arg0: i32) -> (i32, i32, i32) {
    %c0_i32 = arith.constant 0 : i32
    %c0_i32_0 = arith.constant 0 : i32
    %c0_i32_1 = arith.constant 0 : i32
    return %arg0, %c0_i32, %c0_i32_0 : i32, i32, i32
  }
  func.func @transform_1(%arg0: i32) -> (i32, i32) {
    %c0_i32 = arith.constant 0 : i32
    %c0_i32_0 = arith.constant 0 : i32
    %c0_i32_1 = arith.constant 0 : i32
    return %c0_i32, %c0_i32_0 : i32, i32
  }
  func.func @transform_2(%arg0: i32) -> (i32, i32, i32) {
    %c0_i32 = arith.constant 0 : i32
    %c0_i32_0 = arith.constant 0 : i32
    %c0_i32_1 = arith.constant 0 : i32
    %c0_i32_2 = arith.constant 0 : i32
    return %c0_i32, %c0_i32_0, %c0_i32_1 : i32, i32, i32
  }
  func.func @transform_3(%arg0: i32) -> (i32, i32) {
    %c0_i32 = arith.constant 0 : i32
    %c0_i32_0 = arith.constant 0 : i32
    %c0_i32_1 = arith.constant 0 : i32
    return %c0_i32, %c0_i32_0 : i32, i32
  }
  func.func @transform_4(%arg0: i32) -> (i32, i32) {
    %c0_i32 = arith.constant 0 : i32
    %c0_i32_0 = arith.constant 0 : i32
    %c0_i32_1 = arith.constant 0 : i32
    return %c0_i32, %c0_i32_0 : i32, i32
  }
  func.func @transform_5(%arg0: i32) -> (i32, i32) {
    %c0_i32 = arith.constant 0 : i32
    %c0_i32_0 = arith.constant 0 : i32
    %c0_i32_1 = arith.constant 0 : i32
    return %c0_i32, %c0_i32_0 : i32, i32
  }
  func.func @transform_6(%arg0: i32) -> (i32, i32, i32) {
    %c0_i32 = arith.constant 0 : i32
    %c0_i32_0 = arith.constant 0 : i32
    %c0_i32_1 = arith.constant 0 : i32
    return %arg0, %c0_i32, %c0_i32_0 : i32, i32, i32
  }
}

</mosaic_0001>

<bundles_post_ra>
// kernel: tpu_custom_call.1
= control target key start
LH: loop header
LB: loop body
LE: loop exit
PB: predicated region body
PF: predicated region fallthrough
CT: control target
= control target key end

     0   :  { %s2072_s0 = inlined_call_operand.hbm [shape: f32[2,8,128], index: 0, kind: input, shape index: {}]   ;;  %s2073_s1 = inlined_call_operand.hbm [shape: bf16[128,384], index: 1, kind: input, shape index: {}]   ;;  %s2074_s2 = inlined_call_operand.hbm [shape: bf16[1,128,128], index: 2, kind: input, shape index: {}]   ;;  %s2075_s3 = inlined_call_operand.hbm [shape: bf16[128,128], index: 3, kind: input, shape index: {}]   ;;  %s2076_s4 = inlined_call_operand.hbm [shape: bf16[128,128], index: 4, kind: input, shape index: {}]   ;;  %s2077_s5 = inlined_call_operand.vmem [shape: f32[8,128], index: 5, kind: input, shape index: {}]   ;;  %s2078_s6 = inlined_call_operand.hbm [shape: f32[2,8,128], index: 6, kind: output, shape index: {}]  }
   0x1   :  { %2083 = sst [smem:[#allocation16_spill]] %s2073_s1 }
   0x2   :  { %11 = vsyncpa [#allocation3], 0 }
   0x3   :  { %13 = vsyncpa [#allocation3 + $0x1], 0 }
   0x4   :  { %14 = vsyncpa [#allocation6], 0 }
   0x5   :  { %15 = vsyncpa [#allocation9], 0 }
   0x6   :  { %16 = vsyncpa [#allocation4], 0 }
   0x7   :  { %18 = vsyncpa [#allocation4 + $0x1], 0  ;;  %s1787_s21 = smov 0   ;;  %s1789_s22 = smov 0  }
   0x8   :  { %s1791_s23 = smov 0   ;;  %s1793_s24 = smov 0  }
   0x9 LB: > { %s1739_s25 = smov [#allocation5]   ;;  %s1808_s27 = sadd.s32 4294967295, %s1737_s24   ;;  %s1737_s24 = sphi %s1793_s24, %s2104_s24   ;;  %s1733_s23 = sphi %s1791_s23, %s2103_s23   ;;  %s1729_s22 = sphi %s1789_s22, %s2102_s22   ;;  %s1725_s21 = sphi %s1787_s21, %s2101_s21  }
   0xa   : > { %s198_s26 = sshll.u32 %s1739_s25, 4  ;;  %p1175_p0 = scmp.ge.s32.totalorder %s1737_s24, 1  ;;  %s199_s26 = int_to_ptr.vmem [resolvable:$true] %s198_s26 }
   0xb   : > { %p2079_p1 = scmp.eq.s32.totalorder %s1808_s27, 0  ;;  %p186_p2 = scmp.lt.s32.totalorder %s1737_s24, 3 }
   0xc   : > { %s1740_s30 = smov [#allocation8]   ;;  %s1741_s8 = smov [#allocation7]  }
   0xd   : > { %p1813_p3 = pnand %p1175_p0, %p186_p2  ;;  %s224_s7 = sshll.u32 %s1740_s30, 4  ;;  %s1826_s7 = int_to_ptr.vmem [resolvable:$true] %s224_s7 }
   0xe   : > { %s1828_s9 = sshll.u32 %s1741_s8, 4  ;;  %s1544_s10 = scalar_lea.vmem %s199_s26, 3072  ;;  %s212_s9 = int_to_ptr.vmem [resolvable:$true] %s1828_s9 }
   0xf   : > { %s2084_s28 = scalar_select %p1813_p3, 1, 0 }
  0x10   : > { %p1395_p5 = pneg %p1813_p3  ;;  %p1545_p8 = scmp.ne.s32.totalorder %s199_s26, %s1544_s10 }
  0x11   : > { %p1552_p11 = scmp.lt.s32.totalorder %s199_s26, %s199_s26  ;;  %p1553_p12 = scmp.lt.s32.totalorder %s1544_s10, %s1544_s10 }
  0x12   : > { %p1822_p6 = pnand %p1395_p5, %p2079_p1 }
  0x13   : > { %p1554_p13 = por %p1553_p12, %p1552_p11 }
  0x14   : > { %p1535_p7 = pneg %p1822_p6 }
  0x16   : > { %p1547_p9 = pnand %p1545_p8, %p1535_p7 }
  0x18   : > { %p1548_p10 = pneg %p1547_p9 }
  0x1a   : > { %p1555_p0 = pnand %p1554_p13, %p1548_p10 }
  0x1c   : > { %1558 = shalt.err (!%p1555_p0)
}
  0x1d   : > { %s1742_s11 = smov 192   ;;  %s1743_s12 = smov 12  }
  0x1e   : > { %s2086_s1 = sld [smem:[#allocation16_spill]]  ;;  %s1570_s15 = scalar_lea.vmem %s1826_s7, 1024 }
  0x1f   : > { %p1571_p2 = scmp.ne.s32.totalorder %s1826_s7, %s1570_s15  ;;  %p1578_p9 = scmp.lt.s32.totalorder %s1826_s7, %s1826_s7 }
  0x20   : > { %p1579_p10 = scmp.lt.s32.totalorder %s1570_s15, %s1570_s15 }
  0x21   : > { %p1573_p5 = pnand %p1571_p2, %p1535_p7 }
  0x22   : > { %p1580_p11 = por %p1579_p10, %p1578_p9 }
  0x23   : > { %p1574_p8 = pneg %p1573_p5 }
  0x24   : > { %1398 = dma.hbm_to_vmem [thread:$0]  (!%p1822_p6), %s2086_s1, 3072, %s199_s26, [#allocation6], %s1742_s11, %s1742_s11, %s1743_s12  }
  0x25   : > { %p1581_p12 = pnand %p1580_p11, %p1574_p8 }
  0x27   : > { %1584 = shalt.err (!%p1581_p12)
}
  0x28   : > { %s1744_s16 = smov 64   ;;  %s1745_s17 = smov 4  }
  0x29   : > { %1404 = dma.hbm_to_vmem [thread:$0]  (!%p1822_p6), %s2075_s3, 1024, %s1826_s7, [#allocation9], %s1744_s16, %s1744_s16, %s1745_s17  }
  0x2a   : > { %s1596_s20 = scalar_lea.vmem %s212_s9, 1024  ;;  %p1604_p5 = scmp.lt.s32.totalorder %s212_s9, %s212_s9 }
  0x2b   : > { %p1597_p13 = scmp.ne.s32.totalorder %s212_s9, %s1596_s20  ;;  %p1605_p8 = scmp.lt.s32.totalorder %s1596_s20, %s1596_s20 }
  0x2d   : > { %p1599_p0 = pnand %p1597_p13, %p1535_p7  ;;  %p1606_p9 = por %p1605_p8, %p1604_p5 }
  0x2f   : > { %p1600_p2 = pneg %p1599_p0 }
  0x31   : > { %p1607_p10 = pnand %p1606_p9, %p1600_p2 }
  0x33   : > { %1610 = shalt.err (!%p1607_p10)
}
  0x34   : > { %1401 = dma.hbm_to_vmem [thread:$0]  (!%p1822_p6), %s2074_s2, 1024, %s212_s9, [#allocation6], %s1744_s16, %s1744_s16, %s1745_s17  }
  0x35   : > { %s1746_s30 = smov [#allocation10]  }
  0x36   : > { %s237_s7 = sshll.u32 %s1746_s30, 4  ;;  %s238_s7 = int_to_ptr.vmem [resolvable:$true] %s237_s7 }
  0x37   : > { %s1622_s8 = scalar_lea.vmem %s238_s7, 1024  ;;  %p1630_p0 = scmp.lt.s32.totalorder %s238_s7, %s238_s7 }
  0x38   : > { %p1623_p11 = scmp.ne.s32.totalorder %s238_s7, %s1622_s8  ;;  %p1631_p5 = scmp.lt.s32.totalorder %s1622_s8, %s1622_s8 }
  0x3a   : > { %p1625_p12 = pnand %p1623_p11, %p1535_p7  ;;  %p1632_p2 = por %p1631_p5, %p1630_p0 }
  0x3c   : > { %p1626_p13 = pneg %p1625_p12 }
  0x3e   : > { %p1633_p8 = pnand %p1632_p2, %p1626_p13 }
  0x40   : > { %1636 = shalt.err (!%p1633_p8)
}
  0x41   : > { %1407 = dma.hbm_to_vmem [thread:$0]  (!%p1822_p6), %s2076_s4, 1024, %s238_s7, [#allocation9], %s1744_s16, %s1744_s16, %s1745_s17  }
  0x42   : > { %s1174_s9 = sadd.s32 4294967294, %s1737_s24   ;;  %s1872_s29 = sadd.s32 1, %s1737_s24  }
  0x43   : > { %s28_s12 = ssub.s32 %s1737_s24, %s1872_s29  ;;  %s31_s13 = sadd.s32 1, %s1733_s23 }
  0x44   : > { %p29_p7 = scmp.eq.s32.totalorder %s28_s12, 0  ;;  %p38_p9 = scmp.ne.s32.totalorder %s1733_s23, %s1729_s22 }
  0x45   : > { %p39_p10 = scmp.eq.s32.totalorder %s1737_s24, 0  ;;  %p44_p11 = scmp.ne.s32.totalorder %s1729_s22, %s1725_s21 }
  0x46   : > { %s1883_s14 = scalar_select %p29_p7, %s1733_s23, %s31_s13  }
  0x47   : > { %p1885_p12 = por %p39_p10, %p38_p9  ;;  %p1891_p6 = por %p2079_p1, %p44_p11 }
  0x48   : > { %p173_p13 = scmp.eq.s32.totalorder %s1808_s27, 1  ;;  %p179_p0 = scmp.eq.s32.totalorder %s1174_s9, 1 }
  0x49   : > { %s2088_s16 = scalar_select %p1891_p6, 1, 0 }
  0x4a   : > { %p1420_p5 = scmp.lt.s32.totalorder %s1737_s24, 2  ;;  %s254_s17 = sand.u32 1, %s1733_s23  }
  0x4b   : > { %p1898_p2 = por %p173_p13, %p38_p9  ;;  %p1902_p8 = por %p179_p0, %p44_p11 }
  0x4c   : > { %s1181_s20 = sshll.u32 %s254_s17, 3  ;;  %s1182_s25 = sshll.u32 %s1737_s24, 7 }
  0x4d   : > { %s2089_s18 = scalar_select %p1898_p2, 1, 0 }
  0x4e   : > { %s2090_s19 = scalar_select %p1902_p8, 1, 0 }
  0x4f   : > { %s1910_s7 = scalar_lea.hbm %s2072_s0, %s1182_s25  ;;  %s258_s8 = scalar_lea.vmem [#allocation2], %s1181_s20 }
  0x50   : > { %s265_s10 = sshll.u32 %s258_s8, 4  ;;  %p1914_p7 = pnand %p1420_p5, %p1885_p12  ;;  %s266_s10 = int_to_ptr.vmem [resolvable:$true] %s265_s10 }
  0x51   : > { %s255_s9 = scalar_lea.sflag [#allocation3], %s254_s17  ;;  %s1637_s12 = scalar_lea.hbm %s1910_s7, 128 }
  0x52   : > { %p1638_p9 = scmp.ne.s32.totalorder %s1910_s7, %s1637_s12  ;;  %p1639_p10 = pneg %p1914_p7 }
  0x53   : > { %s1642_s26 = scalar_lea.hbm %s2072_s0, 256  ;;  %p1643_p0 = scmp.lt.s32.totalorder %s1910_s7, %s2072_s0 }
  0x54   : > { %p1640_p11 = pnand %p1639_p10, %p1638_p9  ;;  %p1644_p12 = scmp.lt.s32.totalorder %s1642_s26, %s1637_s12 }
  0x56   : > { %p1641_p13 = pneg %p1640_p11  ;;  %p1645_p5 = por %p1644_p12, %p1643_p0 }
  0x58   : > { %p1646_p4 = pnand %p1645_p5, %p1641_p13 }
  0x5a   : > { %1649 = shalt.err (!%p1646_p4)
}
  0x5b   : > { %s1650_s15 = scalar_lea.vmem %s266_s10, 128  ;;  %s1747_s17 = smov [#allocation2]  }
  0x5c   : > { %p1651_p1 = scmp.ne.s32.totalorder %s266_s10, %s1650_s15  ;;  %s1655_s8 = sshll.u32 %s1747_s17, 4  ;;  %s1656_s8 = int_to_ptr.vmem [resolvable:$false] %s1655_s8 }
  0x5d   : > { %s1657_s1 = scalar_lea.vmem %s1656_s8, 256  ;;  %p1658_p9 = scmp.lt.s32.totalorder %s266_s10, %s1656_s8 }
  0x5e   : > { %p1653_p8 = pnand %p1651_p1, %p1639_p10  ;;  %p1659_p11 = scmp.lt.s32.totalorder %s1657_s1, %s1650_s15 }
  0x60   : > { %p1654_p2 = pneg %p1653_p8  ;;  %p1660_p6 = por %p1659_p11, %p1658_p9 }
  0x62   : > { %p1661_p3 = pnand %p1660_p6, %p1654_p2 }
  0x64   : > { %1664 = shalt.err (!%p1661_p3)
}
  0x65   : > { %1411 = dma.hbm_to_vmem [thread:$0]  (!%p1914_p7), %s1910_s7, 128, %s266_s10, %s255_s9  }
  0x66   : > { %p2092_p13 = scmp.ne.s32.totalorder %s2084_s28, 0 }
  0x67   : > { %s1935_s12 = sand.u32 (!%p2092_p13), 1, %s1729_s22   ;;  %p2093_p1 = scmp.ne.s32.totalorder (!%p2092_p13), %s2088_s16, 0 }
  0x68   : > { %274 = sbr.rel (%p2092_p13) target bundleno = 2127 (0x84f), region = 44  ;;  %s1184_s13 = sshll.u32 (!%p2092_p13), %s1935_s12, 3 }
  0x69   : > { %s277_s25 = scalar_lea.sflag (!%p2092_p13), [#allocation3], %s1935_s12  ;;  %s1941_s1 = scalar_lea.vmem (!%p2092_p13), [#allocation2], %s1184_s13 }
  0x6d   : > { %1708 = dma.done.wait (%p2093_p1), %s277_s25, 128  }
  0x6e   : > { %1710 = vsyncadd (%p2093_p1), %s277_s25, 4294967168  ;;  %p2094_p3 = scmp.eq.s32.totalorder %s1808_s27, 0 }
  0x70   : > { %1712 = dma.done.wait (%p2094_p3), [#allocation6], 4096   ;;  %p2095_p4 = pmov %p2094_p3 }
  0x71   : > { %p2096_p6 = pmov %p2094_p3 }
  0x72   : > { %1714 = vsyncadd (%p2095_p4), [#allocation6], 4294963200 }
  0x73   : > { %1716 = dma.done.wait (%p2096_p6), [#allocation9], 2048   ;;  %p2097_p2 = pmov %p2094_p3 }
  0x74   : > { %v1748_v0 = vmov 0   ;;  %v1749_v1 = vmov 0.0   ;;  %vm1750_vm0 = vmmov 0   ;;  %v1469_v2 = vld [vmem:[#allocation5 + $0xac] ss:$12 sps:$4 sm:$0xff]   ;;  %vm627_vm1 = vcmask 1043456  }
  0x75   : > { %1718 = vsyncadd (%p2097_p2), [#allocation9], 4294965248  ;;  %521 = vmatprep.mubr.bf16.mxu0 %v1748_v0  ;;  %1283 = vmatprep.subr.bf16.mxu1 %v1749_v1  ;;  %v1471_v3 = vld [vmem:[#allocation5 + $0xa8] ss:$12 sps:$4 sm:$0xff]   ;;  %v1474_v5 = vld [vmem:[#allocation5 + $0x90] ss:$12 sps:$4 sm:$0xff]  }
  0x76   : > { %1299 = vmatprep.mubr.msk.bf16.mxu1 %vm1750_vm0, %v1749_v1  ;;  %489 = vmatprep.subr.bf16.mxu0 %v1469_v2  ;;  %v1472_v4 = vld [vmem:[#allocation5 + $0x94] ss:$12 sps:$4 sm:$0xff]   ;;  %v1475_v6 = vld [vmem:[#allocation5 + $0x7c] ss:$12 sps:$4 sm:$0xff]   ;;  %v1477_v7 = vld [vmem:[#allocation5 + $0x78] ss:$12 sps:$4 sm:$0xff]  }
  0x77   : > { %490 = vmatpush1.bf16.msra.mxu0 %v1471_v3  ;;  %v1478_v8 = vld [vmem:[#allocation5 + $0x64] ss:$12 sps:$4 sm:$0xff]   ;;  %v1480_v9 = vld [vmem:[#allocation5 + $0x60] ss:$12 sps:$4 sm:$0xff]   ;;  %v1483_v13 = vld [vmem:[#allocation5 + $0x48] ss:$12 sps:$4 sm:$0xff]  }
  0x78   : > { %491 = vmatprep.subr.bf16.mxu0 %v1472_v4  ;;  %v1493_v10 = vld [vmem:[#allocation5 + $0xb0] ss:$12 sps:$4 sm:$0xff]   ;;  %v1481_v11 = vld [vmem:[#allocation5 + $0x4c] ss:$12 sps:$4 sm:$0xff]   ;;  %v1484_v14 = vld [vmem:[#allocation5 + $0x34] ss:$12 sps:$4 sm:$0xff]   ;;  %v690_v4 = vlaneseq }
  0x79   : > { %1284 = vmatpush3.bf16.msra.mxu1 %v1493_v10  ;;  %v1494_v12 = vld [vmem:[#allocation5 + $0x98] ss:$12 sps:$4 sm:$0xff]   ;;  %v1486_v15 = vld [vmem:[#allocation5 + $0x30] ss:$12 sps:$4 sm:$0xff]   ;;  %v1495_v16 = vld [vmem:[#allocation5 + $0x80] ss:$12 sps:$4 sm:$0xff]  }
  0x7a   : > { %1285 = vmatprep.subr.bf16.mxu1 %v1749_v1  ;;  %v1487_v17 = vld [vmem:[#allocation5 + $0x1c] ss:$12 sps:$4 sm:$0xff]   ;;  %v1489_v19 = vld [vmem:[#allocation5 + $0x18] ss:$12 sps:$4 sm:$0xff]   ;;  %v1492_v22 = vld [vmem:[#allocation5] ss:$12 sps:$4 sm:$0xff]  }
  0x7b   : > { %492 = vmatpush1.bf16.msra.mxu0 %v1474_v5  ;;  %v1496_v18 = vld [vmem:[#allocation5 + $0x68] ss:$12 sps:$4 sm:$0xff]   ;;  %v1490_v20 = vld [vmem:[#allocation5 + $0x4] ss:$12 sps:$4 sm:$0xff]   ;;  %v1499_v26 = vld [vmem:[#allocation5 + $0x20] ss:$12 sps:$4 sm:$0xff]  }
  0x7c   : > { %493 = vmatprep.subr.bf16.mxu0 %v1475_v6  ;;  %v1497_v21 = vld [vmem:[#allocation5 + $0x50] ss:$12 sps:$4 sm:$0xff]   ;;  %v1498_v24 = vld [vmem:[#allocation5 + $0x38] ss:$12 sps:$4 sm:$0xff]   ;;  %v1500_v27 = vld [vmem:[#allocation5 + $0x8] ss:$12 sps:$4 sm:$0xff]  }
  0x7d   : > { %1286 = vmatpush3.bf16.msra.mxu1 %v1494_v12  ;;  %v1962_v23 = vld [vmem:[%s1941_s1] sm:$0xff]  ;;  %vm613_vm2 = vcmask 64512   ;;  %v1503_v53 = vld [vmem:[#allocation7 + $0x28] sm:$0xff]   ;;  %v1504_v54 = vld [vmem:[#allocation7 + $0x20] sm:$0xff]   ;;  %v1992_v5 = vshrl.u32 %v690_v4, 7  ;;  %s1240_s7 = sshll.u32 %s1808_s27, 7 }
  0x7e   : > { %1287 = vmatprep.subr.bf16.mxu1 %v1749_v1  ;;  %v327_v25 = vpack.c.bf16 %v1962_v23, %v1962_v23  ;;  %v1501_v51 = vld [vmem:[#allocation7 + $0x38] sm:$0xff]   ;;  %v1502_v52 = vld [vmem:[#allocation7 + $0x30] sm:$0xff]   ;;  %v1507_v57 = vld [vmem:[#allocation7 + $0x8] sm:$0xff]   ;;  %s324_s10 = scalar_lea.vmem [#allocation11], %s1184_s13  ;;  %s1064_s20 = scalar_lea.hbm %s2078_s6, %s1240_s7 }
  0x7f   : > { %494 = vmatpush1.bf16.msra.mxu0 %v1477_v7  ;;  %v1505_v55 = vld [vmem:[#allocation7 + $0x18] sm:$0xff]   ;;  %v1506_v56 = vld [vmem:[#allocation7 + $0x10] sm:$0xff]   ;;  %v1508_v58 = vld [vmem:[#allocation7] sm:$0xff]   ;;  %v692_v6 = vsub.s32 0, %v1992_v5  ;;  %s1066_s11 = sshll.u32 %s324_s10, 4  ;;  %s1053_s30 = scalar_lea.sflag [#allocation4], %s1935_s12  ;;  %s1067_s11 = int_to_ptr.vmem [resolvable:$true] %s1066_s11 }
  0x80   : > { %495 = vmatprep.subr.bf16.mxu0 %v1478_v8  ;;  %v1998_v7 = vld [vmem:[%s2077_s5] sm:$0xff]  ;;  %s1665_s15 = scalar_lea.vmem %s1067_s11, 128  ;;  %p2098_p7 = scmp.ne.s32.totalorder %s2089_s18, 0 }
  0x81   : > { %1288 = vmatpush3.bf16.msra.mxu1 %v1495_v16  ;;  %v693_v8 = vrot.slane %v1998_v7, %v692_v6  ;;  %v1510_v16 = vld [vmem:[#allocation8 + $0x30] sm:$0xff]   ;;  %p1666_p8 = scmp.ne.s32.totalorder %s1067_s11, %s1665_s15  ;;  %s1751_s17 = smov [#allocation11]  }
  0x82   : > { %1289 = vmatprep.subr.bf16.mxu1 %v1749_v1  ;;  %s1669_s8 = sshll.u32 %s1751_s17, 4  ;;  %s1670_s8 = int_to_ptr.vmem [resolvable:$false] %s1669_s8 }
  0x83   : > { %496 = vmatpush1.bf16.msra.mxu0 %v1480_v9  ;;  %p1667_p10 = pnand %p1666_p8, %p2098_p7  ;;  %s1671_s27 = scalar_lea.vmem %s1670_s8, 256 }
  0x84   : > { %497 = vmatprep.subr.bf16.mxu0 %v1481_v11  ;;  %p1672_p12 = scmp.lt.s32.totalorder %s1067_s11, %s1670_s8  ;;  %p1673_p5 = scmp.lt.s32.totalorder %s1671_s27, %s1665_s15 }
  0x85   : > { %1290 = vmatpush3.bf16.msra.mxu1 %v1496_v18  ;;  %p1668_p0 = pneg %p1667_p10 }
  0x86   : > { %1291 = vmatprep.subr.bf16.mxu1 %v1749_v1  ;;  %p1674_p9 = por %p1673_p5, %p1672_p12 }
  0x87   : > { %498 = vmatpush1.bf16.msra.mxu0 %v1483_v13 }
  0x88   : > { %499 = vmatprep.subr.bf16.mxu0 %v1484_v14  ;;  %p1675_p11 = pnand %p1674_p9, %p1668_p0 }
  0x89   : > { %1292 = vmatpush3.bf16.msra.mxu1 %v1497_v21 }
  0x8a   : > { %1293 = vmatprep.subr.bf16.mxu1 %v1749_v1 }
  0x8b   : > { %500 = vmatpush1.bf16.msra.mxu0 %v1486_v15  ;;  %v1509_v15 = vld [vmem:[#allocation8 + $0x38] sm:$0xff]  }
  0x8c   : > { %501 = vmatprep.subr.bf16.mxu0 %v1487_v17  ;;  %v789_v17 = vsub.s32 7, %v1992_v5 }
  0x8d   : > { %1294 = vmatpush3.bf16.msra.mxu1 %v1498_v24 }
  0x8e   : > { %1295 = vmatprep.subr.bf16.mxu1 %v1749_v1 }
  0x8f   : > { %502 = vmatpush1.bf16.msra.mxu0 %v1489_v19 }
  0x90   : > { %503 = vmatprep.subr.bf16.mxu0 %v1490_v20  ;;  %v2006_v20 = vrot.slane %v1998_v7, %v789_v17 }
  0x91   : > { %1296 = vmatpush3.bf16.msra.mxu1 %v1499_v26  ;;  %v1512_v26 = vld [vmem:[#allocation8 + $0x20] sm:$0xff]  }
  0x92   : > { %1297 = vmatprep.subr.bf16.mxu1 %v1749_v1 }
  0x93   : > { %504 = vmatpush1.bf16.msra.mxu0 %v1492_v22 }
  0x94   : > { %1315 = vmatprep.subr.bf16.mxu0 %v1749_v1 }
  0x95   : > { %1298 = vmatpush3.bf16.msra.mxu1 %v1500_v27  ;;  %v1513_v27 = vld [vmem:[#allocation8 + $0x18] sm:$0xff]  }
  0x96   : > { %522 = vmatmul.mubr.bf16.vlgmr.msra.gmra.mxu0 %v327_v25  ;;  %1303 = vmatprep.subr.bf16.mxu1 %v1749_v1 }
  0x97   : > { %1331 = vmatprep.mubr.msk.bf16.mxu0 %vm1750_vm0, %v1749_v1  ;;  %1316 = vmatpush3.bf16.msra.mxu0 %v1501_v51  ;;  %v828_v51 = vsub.s32 3, %v1992_v5 }
  0x98   : > { %1300 = vmatmul.mubr.bf16.vlgmr.msra.gmra.mxu1 %v327_v25  ;;  %1317 = vmatprep.subr.bf16.mxu0 %v1749_v1  ;;  %v1511_v25 = vld [vmem:[#allocation8 + $0x28] sm:$0xff]  }
  0x99   : > { %1305 = vmatprep.mubr.msk.bf16.mxu1 %vm1750_vm0, %v1749_v1 }
  0x9b   : > { %1318 = vmatpush3.bf16.msra.mxu0 %v1502_v52  ;;  %v829_v52 = vrot.slane %v1998_v7, %v828_v51 }
  0x9c   : > { %1319 = vmatprep.subr.bf16.mxu0 %v1749_v1 }
  0x9f   : > { %1320 = vmatpush3.bf16.msra.mxu0 %v1503_v53 }
  0xa0   : > { %1321 = vmatprep.subr.bf16.mxu0 %v1749_v1 }
  0xa3   : > { %1322 = vmatpush3.bf16.msra.mxu0 %v1504_v54 }
  0xa4   : > { %1323 = vmatprep.subr.bf16.mxu0 %v1749_v1 }
  0xa7   : > { %1324 = vmatpush3.bf16.msra.mxu0 %v1505_v55 }
  0xa8   : > { %1325 = vmatprep.subr.bf16.mxu0 %v1749_v1 }
  0xab   : > { %1326 = vmatpush3.bf16.msra.mxu0 %v1506_v56 }
  0xac   : > { %1327 = vmatprep.subr.bf16.mxu0 %v1749_v1 }
  0xaf   : > { %1328 = vmatpush3.bf16.msra.mxu0 %v1507_v57 }
  0xb0   : > { %1329 = vmatprep.subr.bf16.mxu0 %v1749_v1 }
  0xb3   : > { %1330 = vmatpush3.bf16.msra.mxu0 %v1508_v58 }
  0xb4   : > { %1355 = vmatprep.subr.bf16.mxu0 %v1749_v1 }
 0x156   : > { %v523_v28 = vpop.f32.mrf.mxu0 }
 0x157   : > { %v570_v33 = vpack.c.bf16 %v523_v28, %v523_v28  ;;  %v1514_v28 = vld [vmem:[#allocation8 + $0x10] sm:$0xff]  }
 0x158   : > { %v525_v29 = vpop.f32.mrf.mxu0  ;;  %v564_v34 = vpop.f32.mrf.mxu1 }
 0x159   : > { %v571_v30 = vpack.c.bf16 %v525_v29, %v525_v29  ;;  %v572_v35 = vpack.c.bf16 %v564_v34, %v564_v34  ;;  %v1515_v29 = vld [vmem:[#allocation8 + $0x8] sm:$0xff]   ;;  %v1520_v34 = vld [vmem:[#allocation10 + $0x20] sm:$0xff]  }
 0x15a   : > { %v527_v31 = vpop.f32.mrf.mxu0  ;;  %v1301_v36 = vpop.f32.mrf.mxu1 }
 0x15b   : > { %1304 = vmatpush3.bf16.xpose.msra.mxu1 %v571_v30  ;;  %v629_v37 = vsel %vm627_vm1, %v572_v35, 0  ;;  %v1516_v30 = vld [vmem:[#allocation8] sm:$0xff]   ;;  %v1517_v31 = vld [vmem:[#allocation10 + $0x38] sm:$0xff]   ;;  %v1522_v36 = vld [vmem:[#allocation10 + $0x10] sm:$0xff]  }
 0x15c   : > { %v528_v32 = vpop.f32.mrf.mxu0  ;;  %1309 = vmatprep.subr.bf16.mxu1 %v1749_v1  ;;  %v567_v38 = vpop.f32.mrf.mxu1  ;;  %v1521_v35 = vld [vmem:[#allocation10 + $0x18] sm:$0xff]  }
 0x15d   : > { %v1518_v32 = vld [vmem:[#allocation10 + $0x30] sm:$0xff]  }
 0x15e   : > { %v1302_v39 = vpop.f32.mrf.mxu1 }
 0x162   : > { %1306 = vmatmul.mubr.bf16.vlgmr.msra.gmra.mxu1 %v570_v33  ;;  %v1519_v33 = vld [vmem:[#allocation10 + $0x28] sm:$0xff]  }
 0x163   : > { %1311 = vmatprep.mubr.msk.bf16.mxu1 %vm1750_vm0, %v1749_v1  ;;  %1310 = vmatpush3.bf16.msra.mxu1 %v629_v37 }
 0x164   : > { %1335 = vmatprep.subr.bf16.mxu1 %v1749_v1 }
 0x222   : > { %v607_v40 = vpop.f32.mrf.mxu1 }
 0x223   : > { %v614_v41 = vsel %vm613_vm2, %v607_v40, -inf }
 0x224   : > { %615 = vmax.xlane.f32.xlu0 %v614_v41  ;;  %v1307_v42 = vpop.f32.mrf.mxu1  ;;  %v806_v41 = vsub.s32 2, %v1992_v5 }
 0x226   : > { %v610_v43 = vpop.f32.mrf.mxu1 }
 0x228   : > { %v1308_v44 = vpop.f32.mrf.mxu1 }
 0x2ad   : > { %v616_v45 = vpop.xlane.xlu0 %615 }
 0x2ae   : > { %v617_v46 = vsub.f32 %v607_v40, %v616_v45  ;;  %v801_v40 = vsub.s32 1, %v1992_v5  ;;  %v807_v45 = vrot.slane %v1998_v7, %v806_v41 }
 0x2b0   : > { %v618_v47 = vmul.f32 1.442695, %v617_v46  ;;  %v802_v42 = vrot.slane %v1998_v7, %v801_v40 }
 0x2b2   : > { %1525 = vpow2.f32 %v618_v47 }
 0x2bf   : > { %v1526_v48 = vpop.eup %1525 }
 0x2c0   : > { %v620_v49 = vsel %vm613_vm2, %v1526_v48, 0.0  ;;  %v623_v50 = vpack.c.bf16 %v1526_v48, %v1526_v48 }
 0x2c1   : > { %621 = vadd.xlane.f32.xlu0 %v620_v49  ;;  %v1523_v49 = vld [vmem:[#allocation10 + $0x8] sm:$0xff]  }
 0x2c2   : > { %1312 = vmatmul.mubr.msk.bf16.vlgmr.msra.gmra.mxu1 %vm613_vm2, %v623_v50  ;;  %v1524_v50 = vld [vmem:[#allocation10] sm:$0xff]  }
 0x2c3   : > { %1351 = vmatprep.mubr.msk.bf16.mxu1 %vm1750_vm0, %v1749_v1  ;;  %1336 = vmatpush3.bf16.msra.mxu1 %v1509_v15 }
 0x2c4   : > { %1337 = vmatprep.subr.bf16.mxu1 %v1749_v1 }
 0x2c7   : > { %1338 = vmatpush3.bf16.msra.mxu1 %v1510_v16 }
 0x2c8   : > { %1339 = vmatprep.subr.bf16.mxu1 %v1749_v1 }
 0x2cb   : > { %1340 = vmatpush3.bf16.msra.mxu1 %v1511_v25 }
 0x2cc   : > { %1341 = vmatprep.subr.bf16.mxu1 %v1749_v1 }
 0x2cf   : > { %1342 = vmatpush3.bf16.msra.mxu1 %v1512_v26 }
 0x2d0   : > { %1343 = vmatprep.subr.bf16.mxu1 %v1749_v1 }
 0x2d3   : > { %1344 = vmatpush3.bf16.msra.mxu1 %v1513_v27 }
 0x2d4   : > { %1345 = vmatprep.subr.bf16.mxu1 %v1749_v1 }
 0x2d7   : > { %1346 = vmatpush3.bf16.msra.mxu1 %v1514_v28 }
 0x2d8   : > { %1347 = vmatprep.subr.bf16.mxu1 %v1749_v1 }
 0x2db   : > { %1348 = vmatpush3.bf16.msra.mxu1 %v1515_v29 }
 0x2dc   : > { %1349 = vmatprep.subr.bf16.mxu1 %v1749_v1 }
 0x2df   : > { %1350 = vmatpush3.bf16.msra.mxu1 %v1516_v30 }
 0x34a   : > { %v622_v59 = vpop.xlane.xlu0 %621 }
 0x34b   : > { %1527 = vrcp.f32 %v622_v59 }
 0x358   : > { %v1528_v60 = vpop.eup %1527 }
 0x382   : > { %v665_v61 = vpop.f32.mrf.mxu1 }
 0x383   : > { %v672_v62 = vmul.f32 %v1528_v60, %v665_v61  ;;  %v938_v60 = vsub.s32 4, %v1992_v5 }
 0x384   : > { %v1313_v63 = vpop.f32.mrf.mxu1 }
 0x385   : > { %v673_v0 = vpack.c.bf16 %v672_v62, %v672_v62  ;;  %v939_v61 = vrot.slane %v1998_v7, %v938_v60 }
 0x386   : > { %v668_v2 = vpop.f32.mrf.mxu1 }
 0x387   : > { %1332 = vmatmul.mubr.bf16.vlgmr.msra.gmra.mxu0 %v673_v0 }
 0x388   : > { %v1314_v3 = vpop.f32.mrf.mxu1  ;;  %1371 = vmatprep.mubr.msk.bf16.mxu0 %vm1750_vm0, %v1749_v1  ;;  %1356 = vmatpush3.bf16.msra.mxu0 %v1517_v31 }
 0x389   : > { %1357 = vmatprep.subr.bf16.mxu0 %v1749_v1 }
 0x38c   : > { %1358 = vmatpush3.bf16.msra.mxu0 %v1518_v32 }
 0x38d   : > { %1359 = vmatprep.subr.bf16.mxu0 %v1749_v1 }
 0x390   : > { %1360 = vmatpush3.bf16.msra.mxu0 %v1519_v33 }
 0x391   : > { %1361 = vmatprep.subr.bf16.mxu0 %v1749_v1 }
 0x394   : > { %1362 = vmatpush3.bf16.msra.mxu0 %v1520_v34 }
 0x395   : > { %1363 = vmatprep.subr.bf16.mxu0 %v1749_v1 }
 0x398   : > { %1364 = vmatpush3.bf16.msra.mxu0 %v1521_v35 }
 0x399   : > { %1365 = vmatprep.subr.bf16.mxu0 %v1749_v1 }
 0x39c   : > { %1366 = vmatpush3.bf16.msra.mxu0 %v1522_v36 }
 0x39d   : > { %1367 = vmatprep.subr.bf16.mxu0 %v1749_v1 }
 0x3a0   : > { %1368 = vmatpush3.bf16.msra.mxu0 %v1523_v49 }
 0x3a1   : > { %1369 = vmatprep.subr.bf16.mxu0 %v1749_v1 }
 0x3a4   : > { %1370 = vmatpush3.bf16.msra.mxu0 %v1524_v50 }
 0x447   : > { %v776_v9 = vpop.f32.mrf.mxu0 }
 0x448   : > { %v777_v10 = vadd.f32 %v776_v9, %v693_v8 }
 0x449   : > { %v1333_v11 = vpop.f32.mrf.mxu0 }
 0x44a   : > { %v782_v12 = vadd.f32 %v777_v10, %v1962_v23 }
 0x44b   : > { %v779_v13 = vpop.f32.mrf.mxu0 }
 0x44c   : > { %783 = vadd.xlane.f32.xlu1 %v782_v12 }
 0x44d   : > { %v1334_v14 = vpop.f32.mrf.mxu0 }
 0x44e   : > { %v1043_v14 = vsub.s32 5, %v1992_v5 }
 0x450   : > { %v1044_v15 = vrot.slane %v1998_v7, %v1043_v14 }
 0x4d5   : > { %v784_v18 = vpop.xlane.xlu1 %783 }
 0x4d6   : > { %v785_v19 = vmul.f32 0.03125, %v784_v18 }
 0x4d8   : > { %v786_v21 = vsub.f32 %v782_v12, %v785_v19 }
 0x4da   : > { %v791_v22 = vmul.f32 %v2006_v20, %v786_v21 }
 0x4dc   : > { %v792_v24 = vmul.f32 %v791_v22, %v791_v22 }
 0x4de   : > { %793 = vadd.xlane.f32.xlu1 %v792_v24 }
 0x567   : > { %v794_v37 = vpop.xlane.xlu1 %793 }
 0x568   : > { %v795_v38 = vmul.f32 0.03125, %v794_v37 }
 0x56a   : > { %v796_v39 = vadd.f32 1e-05, %v795_v38 }
 0x56c   : > { %1529 = vrsqrt.f32 %v796_v39 }
 0x579   : > { %v1530_v43 = vpop.eup %1529 }
 0x57a   : > { %v798_v44 = vmul.f32 %v1530_v43, %v791_v22 }
 0x57c   : > { %v803_v46 = vmul.f32 %v802_v42, %v798_v44 }
 0x57e   : > { %v808_v47 = vadd.f32 %v807_v45, %v803_v46 }
 0x580   : > { %v809_v48 = vpack.c.bf16 %v808_v47, %v808_v47 }
 0x582   : > { %1352 = vmatmul.mubr.bf16.vlgmr.msra.gmra.mxu1 %v809_v48 }
 0x642   : > { %v912_v53 = vpop.f32.mrf.mxu1 }
 0x643   : > { %v913_v54 = vadd.f32 %v912_v53, %v829_v52 }
 0x644   : > { %v1353_v55 = vpop.f32.mrf.mxu1 }
 0x645   : > { %v918_v56 = vmax.f32 %v913_v54, 0.0 }
 0x646   : > { %v915_v57 = vpop.f32.mrf.mxu1 }
 0x647   : > { %v919_v58 = vpack.c.bf16 %v918_v56, %v918_v56 }
 0x648   : > { %v1354_v59 = vpop.f32.mrf.mxu1 }
 0x649   : > { %1372 = vmatmul.mubr.bf16.vlgmr.msra.gmra.mxu0 %v919_v58 }
 0x709   : > { %v1022_v62 = vpop.f32.mrf.mxu0 }
 0x70a   : > { %v1023_v1 = vadd.f32 %v1022_v62, %v939_v61 }
 0x70b   : > { %v1373_v63 = vpop.f32.mrf.mxu0 }
 0x70c   : > { %v1028_v0 = vadd.f32 %v1023_v1, %v1962_v23  ;;  %v1048_v23 = vsub.s32 6, %v1992_v5 }
 0x70d   : > { %v1025_v2 = vpop.f32.mrf.mxu0 }
 0x70e   : > { %1029 = vadd.xlane.f32.xlu0 %v1028_v0  ;;  %v1049_v18 = vrot.slane %v1998_v7, %v1048_v23 }
 0x70f   : > { %v1374_v3 = vpop.f32.mrf.mxu0 }
 0x797   : > { %v1030_v4 = vpop.xlane.xlu0 %1029 }
 0x798   : > { %v1031_v6 = vmul.f32 0.03125, %v1030_v4 }
 0x79a   : > { %v1032_v8 = vsub.f32 %v1028_v0, %v1031_v6 }
 0x79c   : > { %v1033_v9 = vmul.f32 %v1032_v8, %v2006_v20 }
 0x79e   : > { %v1034_v10 = vmul.f32 %v1033_v9, %v1033_v9 }
 0x7a0   : > { %1035 = vadd.xlane.f32.xlu1 %v1034_v10 }
 0x829   : > { %v1036_v11 = vpop.xlane.xlu1 %1035 }
 0x82a   : > { %v1037_v12 = vmul.f32 0.03125, %v1036_v11 }
 0x82c   : > { %v1038_v13 = vadd.f32 1e-05, %v1037_v12 }
 0x82e   : > { %1531 = vrsqrt.f32 %v1038_v13 }
 0x83b   : > { %v1532_v16 = vpop.eup %1531 }
 0x83c   : > { %v1040_v17 = vmul.f32 %v1532_v16, %v1033_v9 }
 0x83e   : > { %v1045_v19 = vmul.f32 %v1044_v15, %v1040_v17 }
 0x840   : > { %v1050_v20 = vadd.f32 %v1049_v18, %v1045_v19 }
 0x842   : > { %1051 = vst [vmem:[%s324_s10] sm:$0xff] %v1050_v20 }
 0x843   : > { %1678 = shalt.err (!%p1675_p11)
}
 0x844   : > { %s1679_s13 = scalar_lea.hbm %s1064_s20, 128  ;;  %s1683_s1 = scalar_lea.hbm %s2078_s6, 256 }
 0x845   : > { %p1680_p13 = scmp.ne.s32.totalorder %s1064_s20, %s1679_s13  ;;  %p1684_p4 = scmp.lt.s32.totalorder %s1064_s20, %s2078_s6 }
 0x846   : > { %p1685_p6 = scmp.lt.s32.totalorder %s1683_s1, %s1679_s13 }
 0x847   : > { %p1681_p1 = pnand %p1680_p13, %p2098_p7 }
 0x848   : > { %p1686_p2 = por %p1685_p6, %p1684_p4 }
 0x849   : > { %p1682_p3 = pneg %p1681_p1 }
 0x84b   : > { %p1687_p8 = pnand %p1686_p2, %p1682_p3 }
 0x84d   : > { %1690 = shalt.err (!%p1687_p8)
}
 0x84e   : > { %1393 = dma.vmem_to_hbm [thread:$0]  (%p2098_p7), %s1067_s11, 128, %s1064_s20, %s1053_s30  }
 0x84f PF: > { %s1078_s7 = sand.u32 1, %s1725_s21   ;;  %p2099_p10 = scmp.ne.s32.totalorder %s2090_s19, 0 }
 0x850   : > { %p2100_p0 = scmp.ge.s32.totalorder %s1737_s24, 2  ;;  %s1079_s10 = scalar_lea.sflag [#allocation4], %s1078_s7 }
 0x852   : > { %p1413_p12 = pnand %p2100_p0, %p2099_p10 }
 0x854   : > { %p1414_p5 = pneg %p1413_p12 }
 0x856   : > { %1720 = dma.done.wait (%p1414_p5), %s1079_s10, 128  }
 0x857   : > { %1722 = vsyncadd (%p1414_p5), %s1079_s10, 4294967168  ;;  %p21_p9 = scmp.ge.s32.totalorder %s1872_s29, 4   ;;  %s2101_s21 = smov %s1729_s22 }
 0x858   : > { %s2102_s22 = smov %s1733_s23  ;;  %s2103_s23 = smov %s1883_s14 }
 0x859   : > { %s2104_s24 = smov %s1872_s29  ;;  %23 = sbr.rel (!%p21_p9) target bundleno = 9 (0x9), region = 105 }
 0x85e   :  { %1084 = vsyncpa [#allocation3], 1 }
 0x85f   :  { %1086 = vsyncpa [#allocation3 + $0x1], 1 }
 0x860   :  { %1087 = vsyncpa [#allocation6], 1 }
 0x861   :  { %1088 = vsyncpa [#allocation9], 1 }
 0x862   :  { %1089 = vsyncpa [#allocation4], 1 }
 0x863   :  { %1091 = vsyncpa [#allocation4 + $0x1], 1 }

</bundles_post_ra>
